<compile_context>
chip_gen: v6e
topology: v6e:2x2x1
jax: 0.10.0
libtpu: 0.0.40
codegen_flags: <defaults>
</compile_context>

<pallas_src>
import math

import jax
import jax.numpy as jnp
from jax.experimental import pallas as pl
from jax.experimental.pallas import tpu as pltpu


# ----------------------------- kernel ---------------------------------------
def _cache_layer_kernel(x_ref, w_ref, b_ref, out_ref):
    # x_ref:   (TB, d_in)   compute-dtype batch tile
    # w_ref:   (d_in, TN)   streamed N-tile of the flattened weight
    #                       (resident across the inner batch axis)
    # b_ref:   (1, TN)      f32 effective-bias tile (b + b_pre @ W, folded once)
    # out_ref: (TB, TN)     lane-dense output tile
    acc = jnp.dot(x_ref[...], w_ref[...], preferred_element_type=jnp.float32)
    acc = acc + b_ref[...]                                   # broadcast over batch
    out_ref[...] = jnp.maximum(acc, 0.0).astype(out_ref.dtype)   # ReLU


# ----------------------------- helpers ---------------------------------------
def _round_up(x, m):
    return (x + m - 1) // m * m


def _vmem_limit_bytes():
    """Generation-aware VMEM budget: leave headroom under the physical per-core VMEM."""
    cap = 64 << 20  # conservative fallback = v7x per-TC capacity
    try:
        info = pltpu.get_tpu_info()
        cap = int(getattr(info, "vmem_capacity_bytes", cap))
    except Exception:
        pass
    # v7x (64 MiB)  -> 48 MiB; v5e/v6e (128 MiB) -> 112 MiB
    return int(min(max(cap - (16 << 20), 32 << 20), 112 << 20))


# ----------------------------- one-time parameter prep ------------------------
def prepare_cache_layer(W, b, b_pre=None, *, compute_dtype=jnp.bfloat16,
                        max_batch_tile=512):
    """One-time CacheLayer parameter preparation (call at init, NOT per forward).

    * Folds b_pre algebraically into an effective bias:
        (x + b_pre[i]) @ W[i] + b[i] == x @ W[i] + (b[i] + b_pre[i] @ W[i])
    * Flattens/transposes W to a lane-dense (d_in, n_inst*d_out) layout, casts it to
      `compute_dtype` and zero-pads the lane dim -- so the per-call path never
      touches W in f32 and never re-lays it out.
    * Picks the lane tile TN from a per-generation VMEM byte budget that accounts
      for the double-buffered W / bias / output tiles and the resident x tile.
    """
    inst_shape = W.shape[:-2]
    d_in, d_out = W.shape[-2], W.shape[-1]
    n_inst = int(math.prod(inst_shape)) if inst_shape else 1
    n_total = n_inst * d_out

    Wf = W.astype(jnp.float32).reshape(n_inst, d_in, d_out)
    if b_pre is None:
        b_eff = b.astype(jnp.float32).reshape(n_inst, d_out)
    else:
        b_eff = (b.astype(jnp.float32).reshape(n_inst, d_out)
                 + jnp.einsum("ni,nio->no",
                              b_pre.astype(jnp.float32).reshape(n_inst, d_in), Wf))

    w_flat = jnp.transpose(Wf, (1, 0, 2)).reshape(d_in, n_total).astype(compute_dtype)
    b_flat = b_eff.reshape(1, n_total).astype(jnp.float32)

    # ---- tile selection (static, batch-independent) ----
    cbytes = jnp.dtype(compute_dtype).itemsize
    obytes = 4                          # size the output term conservatively (f32)
    vmem_limit = _vmem_limit_bytes()
    n_pad = _round_up(n_total, 128)

    tb_max = max(8, _round_up(min(int(max_batch_tile), 512), 8))
    budget = vmem_limit - (4 << 20) - 2 * tb_max * d_in * cbytes   # minus x tiles + headroom
    # per-128-lane cost of double-buffered W + bias + out tiles
    per_lane = 2 * (d_in * cbytes + 8 * 4 + tb_max * obytes)
    tn = max(128, (budget // per_lane) // 128 * 128)
    # keep a single W buffer a modest fraction of the budget
    tn = min(tn, max(128, (budget // 4) // max(1, d_in * cbytes) // 128 * 128))
    # keep >= 4 N-steps when possible (feeds both v7x TCs, preserves pipeline overlap)
    if n_pad >= 4 * 128:
        tn = min(tn, max(128, (n_pad // 4) // 128 * 128))
    tn = min(tn, n_pad)
    n_pad = _round_up(n_pad, tn)

    if n_pad != n_total:
        w_flat = jnp.pad(w_flat, ((0, 0), (0, n_pad - n_total)))
        b_flat = jnp.pad(b_flat, ((0, 0), (0, n_pad - n_total)))

    return {
        "w_flat": w_flat, "b_flat": b_flat,
        "inst_shape": inst_shape, "n_inst": n_inst,
        "d_in": d_in, "d_out": d_out,
        "n_total": n_total, "n_pad": n_pad, "tn": tn, "tb_max": tb_max,
        "compute_dtype": compute_dtype, "vmem_limit": vmem_limit,
    }


# ----------------------------- forward ---------------------------------------
def cache_layer_forward(x, params, *, out_dtype=None):
    """CacheLayer.forward on prepared params. Returns acts: (batch, *inst, d_out)."""
    batch, d_in = x.shape
    assert d_in == params["d_in"]
    out_dtype = x.dtype if out_dtype is None else out_dtype

    w_flat = params["w_flat"]
    b_flat = params["b_flat"]
    tn = params["tn"]
    n_pad = params["n_pad"]
    n_total = params["n_total"]
    compute_dtype = params["compute_dtype"]

    # pad batch to a sublane multiple (unmasked stores) and pick the batch tile
    batch_pad = _round_up(batch, 8)
    tb = batch_pad if batch_pad <= params["tb_max"] else params["tb_max"]
    batch_pad = _round_up(batch_pad, tb)

    x_c = x.astype(compute_dtype)
    if batch_pad != batch:
        x_c = jnp.pad(x_c, ((0, batch_pad - batch), (0, 0)))

    grid_n = n_pad // tn
    grid_b = batch_pad // tb

    cbytes = jnp.dtype(compute_dtype).itemsize
    obytes = jnp.dtype(out_dtype).itemsize
    cost = pl.CostEstimate(
        flops=2 * batch_pad * d_in * n_pad,
        transcendentals=0,
        bytes_accessed=(w_flat.size * cbytes            # W streamed exactly once
                        + grid_n * x_c.size * cbytes    # x re-read per N-tile (tiny)
                        + b_flat.size * 4
                        + batch_pad * n_pad * obytes),
    )

    out_flat = pl.pallas_call(
        _cache_layer_kernel,
        out_shape=jax.ShapeDtypeStruct((batch_pad, n_pad), out_dtype),
        grid_spec=pltpu.PrefetchScalarGridSpec(
            num_scalar_prefetch=0,
            # N-tiles outer, batch-tiles inner: W is DMA'd from HBM exactly once.
            grid=(grid_n, grid_b),
            in_specs=[
                pl.BlockSpec((tb, d_in), lambda j, bi: (bi, 0)),   # x batch tile
                pl.BlockSpec((d_in, tn), lambda j, bi: (0, j)),    # W N-tile
                pl.BlockSpec((1, tn), lambda j, bi: (0, j)),       # effective bias
            ],
            out_specs=pl.BlockSpec((tb, tn), lambda j, bi: (bi, j)),
        ),
        compiler_params=pltpu.CompilerParams(
            dimension_semantics=("parallel", "parallel"),   # megacore can split either axis
            vmem_limit_bytes=params["vmem_limit"],
        ),
        cost_estimate=cost,
    )(x_c, w_flat, b_flat)

    out = out_flat[:batch, :n_total]
    return out.reshape((batch,) + tuple(params["inst_shape"]) + (params["d_out"],))


# ----------------------------- init helper ------------------------------------
def _kaiming_uniform(key, shape):
    # Mimics torch.nn.init.kaiming_uniform_ defaults (a=0 -> gain=sqrt(2),
    # fan_in = shape[-2] for the trailing (d_in, d_out) matrix).
    fan_in = shape[1] * int(math.prod(shape[2:])) if len(shape) > 2 else shape[0]
    gain = math.sqrt(2.0)
    bound = gain * math.sqrt(3.0 / fan_in)
    return jax.random.uniform(key, shape, jnp.float32, -bound, bound)


if __name__ == "__main__":
    batch, d_in, d_out, n_inst = 8, 32, 64, 4

    key = jax.random.PRNGKey(0)
    kx, kw, kp = jax.random.split(key, 3)

    # CacheLayer.from_dims(d_in, d_out, bias=True, b_in=False, inst=(n_inst,)):
    W = _kaiming_uniform(kw, (n_inst, d_in, d_out))      # kaiming-uniform weight
    b = jnp.zeros((n_inst, d_out), dtype=jnp.float32)    # bias=True -> zeros
    x = jax.random.normal(kx, (batch, d_in), dtype=jnp.float32)

    # --- path 1: b_pre = None (default b_in=False), bf16 weight streaming ---
    params = prepare_cache_layer(W, b, None)              # one-time prep (hoisted)
    acts = jax.block_until_ready(cache_layer_forward(x, params))
    ref = jnp.maximum(jnp.einsum("bi,nio->bno", x, W) + b[None, :, :], 0.0)
    assert acts.shape == (batch, n_inst, d_out)
    assert jnp.allclose(acts, ref, atol=2e-2, rtol=2e-2)   # bf16-compute tolerance

    # --- path 2: nonzero b_pre (validates the hoisted effective-bias path) ---
    b_pre = 0.1 * jax.random.normal(kp, (n_inst, d_in), dtype=jnp.float32)
    params2 = prepare_cache_layer(W, b, b_pre)
    acts2 = jax.block_until_ready(cache_layer_forward(x, params2))
    ref2 = jnp.maximum(
        jnp.einsum("bni,nio->bno", x[:, None, :] + b_pre[None, :, :], W)
        + b[None, :, :],
        0.0,
    )
    assert acts2.shape == (batch, n_inst, d_out)
    assert jnp.allclose(acts2, ref2, atol=2e-2, rtol=2e-2)

    # --- path 3: f32 compute parity path + odd batch (exercises batch padding) ---
    params3 = prepare_cache_layer(W, b, None, compute_dtype=jnp.float32)
    x5 = x[:5]
    acts3 = jax.block_until_ready(cache_layer_forward(x5, params3))
    ref3 = jnp.maximum(jnp.einsum("bi,nio->bno", x5, W) + b[None, :, :], 0.0)
    assert acts3.shape == (5, n_inst, d_out)
    assert jnp.allclose(acts3, ref3, atol=2e-2, rtol=2e-2)

    print("KERNEL_OK")
</pallas_src>

<mosaic_0001>
module attributes {stable_mosaic.version = 11 : i64} {
  func.func @_cache_layer_kernel(%arg0: i32, %arg1: i32, %arg2: memref<8x32xbf16, #tpu.memory_space<vmem>>, %arg3: memref<32x256xbf16, #tpu.memory_space<vmem>>, %arg4: memref<1x256xf32, #tpu.memory_space<vmem>>, %arg5: memref<8x256xf32, #tpu.memory_space<vmem>>) attributes {dimension_semantics = [#tpu.dimension_semantics<parallel>, #tpu.dimension_semantics<parallel>], iteration_bounds = array<i64: 1, 1>, scalar_prefetch = 0 : i64, scratch_operands = 0 : i64, tpu.core_type = #tpu.core_type<tc>, window_params = [{transform_indices = @transform_0, window_bounds = array<i64: 8, 32>}, {transform_indices = @transform_1, window_bounds = array<i64: 32, 256>}, {transform_indices = @transform_2, window_bounds = array<i64: 1, 256>}, {transform_indices = @transform_3, window_bounds = array<i64: 8, 256>}]} {
    %c0 = arith.constant 0 : index
    %c0_0 = arith.constant 0 : index
    %0 = vector.load %arg2[%c0, %c0_0] : memref<8x32xbf16, #tpu.memory_space<vmem>>, vector<8x32xbf16>
    %c0_1 = arith.constant 0 : index
    %c0_2 = arith.constant 0 : index
    %1 = vector.load %arg3[%c0_1, %c0_2] : memref<32x256xbf16, #tpu.memory_space<vmem>>, vector<32x256xbf16>
    %cst = arith.constant dense<0.000000e+00> : vector<8x256xf32>
    %2 = tpu.matmul %0, %1, %cst {dimension_numbers = #tpu.dot_dimension_numbers<[1], [0], [0], [1], [0, 0, 1, 1], [], []>} : vector<8x32xbf16>, vector<32x256xbf16>, vector<8x256xf32> -> vector<8x256xf32>
    %c0_3 = arith.constant 0 : index
    %c0_4 = arith.constant 0 : index
    %3 = vector.load %arg4[%c0_3, %c0_4] : memref<1x256xf32, #tpu.memory_space<vmem>>, vector<1x256xf32>
    %4 = vector.broadcast %3 : vector<1x256xf32> to vector<8x256xf32>
    %5 = arith.addf %2, %4 : vector<8x256xf32>
    %cst_5 = arith.constant 0.000000e+00 : f32
    %6 = vector.broadcast %cst_5 : f32 to vector<8x256xf32>
    %7 = arith.maximumf %5, %6 : vector<8x256xf32>
    %c0_6 = arith.constant 0 : index
    %c0_7 = arith.constant 0 : index
    %8 = vector.load %arg5[%c0_6, %c0_7] : memref<8x256xf32, #tpu.memory_space<vmem>>, vector<8x256xf32>
    tpu.vector_store %arg5[%c0_6, %c0_7], %7 {strides = array<i32>} : memref<8x256xf32, #tpu.memory_space<vmem>>, vector<8x256xf32>,
    return
  }
  func.func @transform_0(%arg0: i32, %arg1: i32) -> (i32, i32) {
    %c0_i32 = arith.constant 0 : i32
    %c0_i32_0 = arith.constant 0 : i32
    return %arg1, %c0_i32 : i32, i32
  }
  func.func @transform_1(%arg0: i32, %arg1: i32) -> (i32, i32) {
    %c0_i32 = arith.constant 0 : i32
    %c0_i32_0 = arith.constant 0 : i32
    return %c0_i32, %arg0 : i32, i32
  }
  func.func @transform_2(%arg0: i32, %arg1: i32) -> (i32, i32) {
    %c0_i32 = arith.constant 0 : i32
    %c0_i32_0 = arith.constant 0 : i32
    return %c0_i32, %arg0 : i32, i32
  }
  func.func @transform_3(%arg0: i32, %arg1: i32) -> (i32, i32) {
    %c0_i32 = arith.constant 0 : i32
    return %arg1, %arg0 : i32, i32
  }
}

</mosaic_0001>

<bundles_post_ra>
// kernel: tpu_custom_call.1
= control target key start
LH: loop header
LB: loop body
LE: loop exit
PB: predicated region body
PF: predicated region fallthrough
CT: control target
= control target key end

     0   :  { %8 = vsyncpa [#allocation3], 0  ;;  %s265_s0 = inlined_call_operand.hbm [shape: bf16[8,32], index: 0, kind: input, shape index: {}]   ;;  %s266_s1 = inlined_call_operand.hbm [shape: bf16[32,256], index: 1, kind: input, shape index: {}]   ;;  %s267_s2 = inlined_call_operand.vmem [shape: f32[1,256], index: 2, kind: input, shape index: {}]   ;;  %s268_s3 = inlined_call_operand.hbm [shape: f32[8,256], index: 3, kind: output, shape index: {}]  }
   0x1   :  { %9 = vsyncpa [#allocation6], 0 }
   0x2   :  { %10 = vsyncpa [#allocation4], 0  ;;  %s227_s12 = smov [#allocation2]   ;;  %s228_s14 = smov [#allocation5]  }
   0x3   :  { %s17_s13 = sshll.u32 %s227_s12, 4  ;;  %s26_s15 = sshll.u32 %s228_s14, 4  ;;  %s18_s13 = int_to_ptr.vmem [resolvable:$true] %s17_s13  ;;  %s27_s15 = int_to_ptr.vmem [resolvable:$true] %s26_s15 }
   0x4   :  { %s169_s16 = scalar_lea.vmem %s18_s13, 64  ;;  %p174_p1 = scmp.lt.s32.totalorder %s18_s13, %s18_s13 }
   0x5   :  { %p170_p0 = scmp.ne.s32.totalorder %s18_s13, %s169_s16  ;;  %p175_p2 = scmp.lt.s32.totalorder %s169_s16, %s169_s16 }
   0x7   :  { %p176_p3 = por %p175_p2, %p174_p1 }
   0x9   :  { %p177_p4 = pnand %p176_p3, %p170_p0 }
   0xb   :  { %180 = shalt.err (!%p177_p4)
}
   0xc   :  { %20 = dma.hbm_to_vmem [thread:$0]  %s265_s0, 64, %s18_s13, [#allocation3]  }
   0xd   :  { %s189_s19 = scalar_lea.vmem %s27_s15, 512  ;;  %p194_p6 = scmp.lt.s32.totalorder %s27_s15, %s27_s15 }
   0xe   :  { %p190_p5 = scmp.ne.s32.totalorder %s27_s15, %s189_s19  ;;  %p195_p7 = scmp.lt.s32.totalorder %s189_s19, %s189_s19 }
  0x10   :  { %p196_p8 = por %p195_p7, %p194_p6 }
  0x12   :  { %p197_p9 = pnand %p196_p8, %p190_p5 }
  0x14   :  { %200 = shalt.err (!%p197_p9)
}
  0x15   :  { %s229_s20 = smov 128   ;;  %s230_s21 = smov 8  }
  0x16   :  { %32 = dma.hbm_to_vmem [thread:$0]  %s266_s1, 512, %s27_s15, [#allocation6], %s229_s20, %s229_s20, %s230_s21  }
  0x17   :  { %221 = dma.done.wait [#allocation3], 64  }
  0x18   :  { %222 = vsyncadd [#allocation3], 4294967232 }
  0x19   :  { %223 = dma.done.wait [#allocation6], 512  }
  0x1a   :  { %224 = vsyncadd [#allocation6], 4294966784  ;;  %v231_v0 = vmov 0   ;;  %v155_v1 = vld [vmem:[#allocation5 + $0x14] ss:$8 sps:$4 sm:$0xff]   ;;  %vm79_vm0 = vcmask 261120   ;;  %v49_v6 = vlaneseq }
  0x1b   :  { %115 = vmatprep.mubr.bf16.mxu0 %v231_v0  ;;  %v157_v2 = vld [vmem:[#allocation5 + $0x10] ss:$8 sps:$4 sm:$0xff]   ;;  %95 = vmatprep.subr.bf16.mxu0 %v155_v1  ;;  %v158_v3 = vld [vmem:[#allocation5 + $0x4] ss:$8 sps:$4 sm:$0xff]   ;;  %v160_v4 = vld [vmem:[#allocation5] ss:$8 sps:$4 sm:$0xff]  }
  0x1c   :  { %96 = vmatpush1.bf16.msra.mxu0 %v157_v2  ;;  %v42_v5 = vld [vmem:[#allocation2] sm:$0xf]  ;;  %v50_v7 = vshrl.u32 %v49_v6, 7  ;;  %s232_s24 = smov [#allocation7]  }
  0x1d   :  { %97 = vmatprep.subr.bf16.mxu0 %v158_v3  ;;  %v47_v9 = vld [vmem:[%s267_s2] sm:$0x3]  ;;  %s134_s25 = sshll.u32 %s232_s24, 4  ;;  %s135_s25 = int_to_ptr.vmem [resolvable:$true] %s134_s25 }
  0x1e   :  { %v51_v8 = vsub.s32 0, %v50_v7  ;;  %v55_v10 = vsub.s32 1, %v50_v7  ;;  %s201_s26 = scalar_lea.vmem %s135_s25, 256  ;;  %p206_p11 = scmp.lt.s32.totalorder %s135_s25, %s135_s25 }
  0x1f   :  { %p202_p10 = scmp.ne.s32.totalorder %s135_s25, %s201_s26  ;;  %p207_p12 = scmp.lt.s32.totalorder %s201_s26, %s201_s26 }
  0x20   :  { %98 = vmatpush1.bf16.msra.mxu0 %v160_v4  ;;  %v52_v11 = vrot.slane %v47_v9, %v51_v8  ;;  %v56_v12 = vrot.slane %v47_v9, %v55_v10 }
  0x21   :  { %p208_p13 = por %p207_p12, %p206_p11 }
  0x23   :  { %148 = vmatmul.mubr.msk.bf16.vlgmr.msra.gmra.mxu0 %vm79_vm0, %v42_v5  ;;  %p209_p0 = pnand %p208_p13, %p202_p10 }
  0xe3   :  { %v117_v13 = vpop.f32.mrf.mxu0 }
  0xe4   :  { %v118_v14 = vadd.f32 %v117_v13, %v52_v11 }
  0xe5   :  { %v119_v15 = vpop.f32.mrf.mxu0 }
  0xe6   :  { %v124_v16 = vmax.f32 %v118_v14, 0.0  ;;  %v120_v17 = vadd.f32 %v119_v15, %v56_v12 }
  0xe7   :  { %v121_v18 = vpop.f32.mrf.mxu0 }
  0xe8   :  { %126 = vst [vmem:[#allocation7] sm:$0xff] %v124_v16  ;;  %v125_v19 = vmax.f32 %v120_v17, 0.0 }
  0xe9   :  { %v122_v20 = vpop.f32.mrf.mxu0 }
  0xea   :  { %127 = vst [vmem:[#allocation7 + $0x8] sm:$0xff] %v125_v19 }
  0xeb   :  { %212 = shalt.err (!%p209_p0)
}
  0xec   :  { %137 = dma.vmem_to_hbm [thread:$0]  %s135_s25, 256, %s268_s3, [#allocation4]  }
  0xed   :  { %225 = dma.done.wait [#allocation4], 256  }
  0xee   :  { %226 = vsyncadd [#allocation4], 4294967040 }
  0xef   :  { %141 = vsyncpa [#allocation3], 1 }
  0xf0   :  { %142 = vsyncpa [#allocation6], 1 }
  0xf1   :  { %143 = vsyncpa [#allocation4], 1 }

</bundles_post_ra>
